<compile_context>
chip_gen: v7x
topology: tpu7x:2x2x1
jax: 0.10.0
libtpu: 0.0.40
codegen_flags: <defaults>
</compile_context>

<pallas_src>
import jax
import jax.numpy as jnp
from jax.experimental import pallas as pl
from jax.experimental.pallas import tpu as pltpu


# --------------------------------------------------------------------------
# Kernels
# --------------------------------------------------------------------------
def _matmul_kernel_single_k(a_ref, b_ref, o_ref):
    """Fast path: whole K fits in one block -> no accumulator, no branches."""
    o_ref[...] = jnp.dot(
        a_ref[...], b_ref[...], preferred_element_type=jnp.float32
    ).astype(o_ref.dtype)


def _matmul_kernel_acc_f32(a_ref, b_ref, o_ref):
    """K-reduction over grid axis 2, accumulating directly into the f32 output
    block (it stays VMEM-resident across k because its index_map ignores k)."""
    k = pl.program_id(2)
    prod = jnp.dot(a_ref[...], b_ref[...], preferred_element_type=jnp.float32)

    @pl.when(k == 0)
    def _():
        o_ref[...] = prod

    @pl.when(k > 0)
    def _():
        o_ref[...] += prod


def _matmul_kernel_acc_scratch(a_ref, b_ref, o_ref, acc_ref):
    """K-reduction with an f32 scratch accumulator (for non-f32 outputs)."""
    k = pl.program_id(2)
    prod = jnp.dot(a_ref[...], b_ref[...], preferred_element_type=jnp.float32)

    @pl.when(k == 0)
    def _():
        acc_ref[...] = prod

    @pl.when(k > 0)
    def _():
        acc_ref[...] += prod

    @pl.when(k == pl.num_programs(2) - 1)
    def _():
        o_ref[...] = acc_ref[...].astype(o_ref.dtype)


# --------------------------------------------------------------------------
# Helpers
# --------------------------------------------------------------------------
def _round_up(x: int, m: int) -> int:
    return ((x + m - 1) // m) * m


def _cdiv(a: int, b: int) -> int:
    return -(-a // b)


def _sublane(dtype) -> int:
    """Minimum second-to-last-dim granularity for a packed dtype tile."""
    itemsize = jnp.dtype(dtype).itemsize
    return max(8, 32 // max(itemsize, 1))  # 8 (f32), 16 (bf16), 32 (int8/fp8)


def _tpu_vmem_bytes() -> int:
    try:
        return int(pltpu.get_tpu_info().vmem_capacity_bytes)
    except Exception:
        # Conservative default (v7x-sized VMEM) if the query is unavailable.
        return 64 << 20


def _fit_dim(size: int, target: int, gran: int):
    """Pick (tile, padded_size, num_blocks) with only alignment padding.

    If size <= target the whole dim is one (possibly unaligned) full block,
    which is always layout-legal and needs no padding.  Otherwise the tile is
    a multiple of `gran`, sized so padded_size = num_blocks * tile exceeds
    `size` by less than one tile (alignment padding only).
    """
    target = max(target, gran)
    if size <= target:
        return size, size, 1
    nb = _cdiv(size, target)
    tile = _round_up(_cdiv(size, nb), gran)
    return tile, nb * tile, nb


# --------------------------------------------------------------------------
# Wrapper
# --------------------------------------------------------------------------
def matmul(a: jax.Array, b: jax.Array, *, tm: int | None = None,
           tn: int | None = None, tk: int | None = None) -> jax.Array:
    """C = A @ B with A:(M,K), B:(K,N) using a tiled Pallas TPU kernel."""
    M, K = a.shape
    K2, N = b.shape
    assert K == K2, f"inner dims must match, got {K} vs {K2}"

    out_dtype = jnp.result_type(a.dtype, b.dtype)
    vmem_bytes = _tpu_vmem_bytes()

    # Target tiles: 1024x1024 output blocks with 512-deep K steps are past the
    # compute/bandwidth crossover on v6e/v7x and fit every generation's VMEM.
    tm_target = 1024 if tm is None else tm
    tn_target = 1024 if tn is None else tn
    tk_target = 512 if tk is None else tk

    # Layout granularities:
    #   A block (tm, tk): tm % sublane(a/out) == 0, tk % 128 == 0 (or full dim)
    #   B block (tk, tn): tk % sublane(b)    == 0, tn % 128 == 0 (or full dim)
    #   C block (tm, tn): tm % sublane(out)  == 0, tn % 128 == 0 (or full dim)
    sub_m = max(_sublane(a.dtype), _sublane(out_dtype))

    tm, Mp, nb_m = _fit_dim(M, tm_target, sub_m)
    tn, Np, nb_n = _fit_dim(N, tn_target, 128)
    tk, Kp, kt = _fit_dim(K, tk_target, 128)

    # Make sure both TensorCores on v7x get work: if the (M, N) grid would be a
    # single block, split one parallel axis in two (near-zero cost elsewhere).
    if nb_m * nb_n < 2:
        if M >= 2 * sub_m:
            tm = _round_up(_cdiv(_round_up(M, sub_m), 2), sub_m)
            Mp, nb_m = 2 * tm, 2
        elif N >= 2 * 128:
            tn = _round_up(_cdiv(_round_up(N, 128), 2), 128)
            Np, nb_n = 2 * tn, 2

    # Pad only the dims that actually need alignment padding (zeros contribute
    # nothing to the accumulation); aligned shapes are passed through as-is.
    a_p = a if (Mp == M and Kp == K) else jnp.pad(a, ((0, Mp - M), (0, Kp - K)))
    b_p = b if (Kp == K and Np == N) else jnp.pad(b, ((0, Kp - K), (0, Np - N)))

    cost = pl.CostEstimate(
        flops=2 * M * N * K,
        transcendentals=0,
        bytes_accessed=(
            jnp.dtype(a.dtype).itemsize * M * K
            + jnp.dtype(b.dtype).itemsize * K * N
            + jnp.dtype(out_dtype).itemsize * M * N
        ),
    )

    # Scoped-VMEM limit: most of the 128 MiB on v5e/v6e, headroom-below-
    # physical on 64 MiB parts (v7x).
    if vmem_bytes >= (128 << 20):
        vmem_limit = 100 << 20
    else:
        vmem_limit = max(32 << 20, vmem_bytes - (16 << 20))

    if kt == 1:
        # Single K step: no reduction axis, no accumulator.
        out = pl.pallas_call(
            _matmul_kernel_single_k,
            out_shape=jax.ShapeDtypeStruct((Mp, Np), out_dtype),
            grid_spec=pltpu.PrefetchScalarGridSpec(
                num_scalar_prefetch=0,
                grid=(nb_m, nb_n),
                in_specs=[
                    pl.BlockSpec((tm, tk), lambda i, j: (i, 0)),
                    pl.BlockSpec((tk, tn), lambda i, j: (0, j)),
                ],
                out_specs=pl.BlockSpec((tm, tn), lambda i, j: (i, j)),
            ),
            compiler_params=pltpu.CompilerParams(
                dimension_semantics=("parallel", "parallel"),
                vmem_limit_bytes=vmem_limit,
            ),
            cost_estimate=cost,
        )(a_p, b_p)
    else:
        accumulate_in_output = out_dtype == jnp.float32
        kernel = (_matmul_kernel_acc_f32 if accumulate_in_output
                  else _matmul_kernel_acc_scratch)
        scratch = ([] if accumulate_in_output
                   else [pltpu.VMEM((tm, tn), jnp.float32)])
        out = pl.pallas_call(
            kernel,
            out_shape=jax.ShapeDtypeStruct((Mp, Np), out_dtype),
            grid_spec=pltpu.PrefetchScalarGridSpec(
                num_scalar_prefetch=0,
                grid=(nb_m, nb_n, kt),
                in_specs=[
                    pl.BlockSpec((tm, tk), lambda i, j, k: (i, k)),
                    pl.BlockSpec((tk, tn), lambda i, j, k: (k, j)),
                ],
                out_specs=pl.BlockSpec((tm, tn), lambda i, j, k: (i, j)),
                scratch_shapes=scratch,
            ),
            compiler_params=pltpu.CompilerParams(
                dimension_semantics=("parallel", "parallel", "arbitrary"),
                vmem_limit_bytes=vmem_limit,
            ),
            cost_estimate=cost,
        )(a_p, b_p)

    if Mp != M or Np != N:
        out = out[:M, :N]
    return out


# --------------------------------------------------------------------------
# Self-test
# --------------------------------------------------------------------------
if __name__ == "__main__":
    key = jax.random.PRNGKey(0)
    k_a, k_b, k_c, k_d = jax.random.split(key, 4)

    # Case 1: small aligned shapes (single-K-step fast path, default tiles,
    # exercises the 2-block grid split).
    M, K, N = 128, 64, 256
    A = jax.random.normal(k_a, (M, K), dtype=jnp.float32)
    B = jax.random.normal(k_b, (K, N), dtype=jnp.float32)
    C = jax.block_until_ready(matmul(A, B))
    C_ref = jnp.dot(A, B, preferred_element_type=jnp.float32)
    assert C.shape == (M, N)
    assert jnp.allclose(C, C_ref, atol=1e-3, rtol=1e-3), "mismatch (case 1)"

    # Case 2: unaligned shapes + small target tiles to exercise alignment
    # padding and the multi-K-step in-place f32 accumulation path.
    M2, K2, N2 = 100, 384, 200
    A2 = jax.random.normal(k_c, (M2, K2), dtype=jnp.float32)
    B2 = jax.random.normal(k_d, (K2, N2), dtype=jnp.float32)
    C2 = jax.block_until_ready(matmul(A2, B2, tm=64, tn=128, tk=128))
    C2_ref = jnp.dot(A2, B2, preferred_element_type=jnp.float32)
    assert C2.shape == (M2, N2)
    assert jnp.allclose(C2, C2_ref, atol=1e-3, rtol=1e-3), "mismatch (case 2)"

    # Case 3: bf16 inputs -> scratch-accumulator path, dtype-aware sublanes.
    M3, K3, N3 = 96, 256, 128
    A3 = jax.random.normal(k_c, (M3, K3), dtype=jnp.bfloat16)
    B3 = jax.random.normal(k_d, (K3, N3), dtype=jnp.bfloat16)
    C3 = jax.block_until_ready(matmul(A3, B3, tm=64, tn=128, tk=128))
    C3_ref = jnp.dot(A3, B3, preferred_element_type=jnp.float32).astype(jnp.bfloat16)
    assert C3.shape == (M3, N3)
    assert jnp.allclose(C3.astype(jnp.float32), C3_ref.astype(jnp.float32),
                        atol=1e-1, rtol=1e-1), "mismatch (case 3)"

    print("KERNEL_OK")
</pallas_src>

<mosaic_0001>
module attributes {stable_mosaic.version = 11 : i64} {
  func.func @_matmul_kernel_single_k(%arg0: i32, %arg1: i32, %arg2: memref<64x64xf32, #tpu.memory_space<vmem>>, %arg3: memref<64x256xf32, #tpu.memory_space<vmem>>, %arg4: memref<64x256xf32, #tpu.memory_space<vmem>>) attributes {dimension_semantics = [#tpu.dimension_semantics<parallel>, #tpu.dimension_semantics<parallel>], iteration_bounds = array<i64: 2, 1>, scalar_prefetch = 0 : i64, scratch_operands = 0 : i64, tpu.core_type = #tpu.core_type<tc>, window_params = [{transform_indices = @transform_0, window_bounds = array<i64: 64, 64>}, {transform_indices = @transform_1, window_bounds = array<i64: 64, 256>}, {transform_indices = @transform_2, window_bounds = array<i64: 64, 256>}]} {
    %c0 = arith.constant 0 : index
    %c0_0 = arith.constant 0 : index
    %0 = vector.load %arg2[%c0, %c0_0] : memref<64x64xf32, #tpu.memory_space<vmem>>, vector<64x64xf32>
    %c0_1 = arith.constant 0 : index
    %c0_2 = arith.constant 0 : index
    %1 = vector.load %arg3[%c0_1, %c0_2] : memref<64x256xf32, #tpu.memory_space<vmem>>, vector<64x256xf32>
    %cst = arith.constant dense<0.000000e+00> : vector<64x256xf32>
    %2 = tpu.matmul %0, %1, %cst {dimension_numbers = #tpu.dot_dimension_numbers<[1], [0], [0], [1], [0, 0, 1, 1], [], []>} : vector<64x64xf32>, vector<64x256xf32>, vector<64x256xf32> -> vector<64x256xf32>
    %c0_3 = arith.constant 0 : index
    %c0_4 = arith.constant 0 : index
    %3 = vector.load %arg4[%c0_3, %c0_4] : memref<64x256xf32, #tpu.memory_space<vmem>>, vector<64x256xf32>
    tpu.vector_store %arg4[%c0_3, %c0_4], %2 {strides = array<i32>} : memref<64x256xf32, #tpu.memory_space<vmem>>, vector<64x256xf32>,
    return
  }
  func.func @transform_0(%arg0: i32, %arg1: i32) -> (i32, i32) {
    %c0_i32 = arith.constant 0 : i32
    %c0_i32_0 = arith.constant 0 : i32
    return %arg0, %c0_i32 : i32, i32
  }
  func.func @transform_1(%arg0: i32, %arg1: i32) -> (i32, i32) {
    %c0_i32 = arith.constant 0 : i32
    %c0_i32_0 = arith.constant 0 : i32
    return %c0_i32, %arg1 : i32, i32
  }
  func.func @transform_2(%arg0: i32, %arg1: i32) -> (i32, i32) {
    %c0_i32 = arith.constant 0 : i32
    return %arg0, %arg1 : i32, i32
  }
}

</mosaic_0001>

<bundles_post_ra>
// kernel: tpu_custom_call.1
= control target key start
LH: loop header
LB: loop body
LE: loop exit
PB: predicated region body
PF: predicated region fallthrough
CT: control target
= control target key end

     0   :  { %7 = vsyncpa [#allocation3], 0  ;;  %s870_s0 = inlined_call_operand.vmem [shape: f32[128,64], index: 0, kind: input, shape index: {}]   ;;  %s871_s1 = inlined_call_operand.vmem [shape: f32[64,256], index: 1, kind: input, shape index: {}]   ;;  %s872_s2 = inlined_call_operand.hbm [shape: f32[128,256], index: 2, kind: output, shape index: {}]  }
   0x1   :  { %9 = vsyncpa [#allocation3 + $0x1], 0  ;;  %s671_s9 = smov 0   ;;  %s673_s10 = smov 0  }
   0x2   :  { %s675_s11 = smov 0   ;;  %s677_s12 = smov 0  }
   0x3   :  { %s679_s13 = smov 0   ;;  %s681_s14 = smov 0  }
   0x4 LB: > { %s465_s15 = sadd.s32 4294967295, %s650_s14   ;;  %s466_s16 = sadd.s32 4294967294, %s650_s14   ;;  %s650_s14 = sphi %s681_s14, %s15_s14   ;;  %s646_s13 = sphi %s679_s13, %s880_s13   ;;  %s642_s12 = sphi %s677_s12, %s879_s12   ;;  %s638_s11 = sphi %s675_s11, %s878_s11   ;;  %s634_s10 = sphi %s673_s10, %s877_s10   ;;  %s630_s9 = sphi %s671_s9, %s876_s9  }
   0x5   : > { %s27_s17 = sadd.s32 1, %s646_s13  ;;  %s88_s18 = sadd.s32 1, %s638_s11 }
   0x6   : > { %p29_p0 = scmp.ge.s32.totalorder %s27_s17, 2  ;;  %p98_p1 = scmp.ne.s32.totalorder %s638_s11, %s634_s10 }
   0x7   : > { %p99_p2 = scmp.eq.s32.totalorder %s465_s15, 1  ;;  %p104_p3 = scmp.ne.s32.totalorder %s634_s10, %s630_s9 }
   0x8   : > { %s882_s17 = smov (%p29_p0, %s27_s17), 0  ;;  %p105_p5 = scmp.eq.s32.totalorder %s466_s16, 1 }
   0x9   : > { %p711_p4 = por %p99_p2, %p98_p1  ;;  %s83_s20 = ssub.s32 %s646_s13, %s882_s17 }
   0xa   : > { %p470_p6 = scmp.ge.s32.totalorder %s650_s14, 1  ;;  %p86_p7 = scmp.eq.s32.totalorder %s83_s20, 0 }
   0xb   : > { %p718_p8 = por %p105_p5, %p104_p3  ;;  %p141_p9 = scmp.lt.s32.totalorder %s650_s14, 3 }
   0xc   : > { %s724_s22 = scalar_select %p86_p7, %s638_s11, %s88_s18  }
   0xd   : > { %p142_p10 = pnand %p470_p6, %p141_p9 }
   0xe   : > { %v191_v0 = vld [vmem:[%s871_s1 + $0x8] sm:$0xff] (!%p142_p10)  ;;  %v193_v1 = vld [vmem:[%s871_s1 + $0x18] sm:$0xff] (!%p142_p10)  ;;  %v190_v2 = vld [vmem:[%s871_s1] sm:$0xff] (!%p142_p10)  ;;  %s472_s29 = sshll.u32 (!%p142_p10), %s642_s12, 3  ;;  %v652_v7 = vmov (!%p142_p10), 0.0   ;;  %vm206_vm0 = vcmask (!%p142_p10), 523264  }
   0xf   : > { %145 = sbr.rel (%p142_p10) target bundleno = 273 (0x111), region = 28  ;;  %v490_v3 = vpack.c.bf16 (!%p142_p10), %v193_v1, %v191_v0  ;;  %v192_v4 = vld [vmem:[%s871_s1 + $0x10] sm:$0xff] (!%p142_p10)  ;;  %v195_v5 = vld [vmem:[%s871_s1 + $0x28] sm:$0xff] (!%p142_p10)  ;;  %v197_v6 = vld [vmem:[%s871_s1 + $0x38] sm:$0xff] (!%p142_p10)  ;;  %295 = vmatprep.mubr.f32.mxu0 (!%p142_p10), %v652_v7  ;;  %319 = vmatprep.mubr.f32.mxu1 (!%p142_p10), %v652_v7  ;;  %p754_p11 = scmp.lt.s32.totalorder (!%p142_p10), %s472_s29, 15 }
  0x10   : > { %v492_v8 = vpack.c.bf16 (!%p142_p10), %v192_v4, %v190_v2  ;;  %v494_v9 = vpack.c.bf16 (!%p142_p10), %v197_v6, %v195_v5  ;;  %v194_v10 = vld [vmem:[%s871_s1 + $0x20] sm:$0xff] (!%p142_p10)  ;;  %v196_v11 = vld [vmem:[%s871_s1 + $0x30] sm:$0xff] (!%p142_p10)  ;;  %v199_v12 = vld [vmem:[%s871_s1 + $0x48] sm:$0xff] (!%p142_p10)  ;;  %s489_s28 = sshll.u32 (!%p142_p10), %s642_s12, 11  ;;  %s653_s7 = smov (!%p142_p10), [#allocation2]  }
  0x11   : > { %491 = vmatprep.subr.bf16.mxu0 (!%p142_p10), %v490_v3  ;;  %506 = vmatprep.subr.bf16.mxu1 (!%p142_p10), %v490_v3  ;;  %v201_v13 = vld [vmem:[%s871_s1 + $0x58] sm:$0xff] (!%p142_p10)  ;;  %v496_v14 = vpack.c.bf16 (!%p142_p10), %v196_v11, %v194_v10  ;;  %v198_v16 = vld [vmem:[%s871_s1 + $0x40] sm:$0xff] (!%p142_p10)  ;;  %v200_v17 = vld [vmem:[%s871_s1 + $0x50] sm:$0xff] (!%p142_p10)  ;;  %s814_s5 = scalar_lea.hbm (!%p142_p10), %s872_s2, %s489_s28  ;;  %s576_s8 = sshll.u32 (!%p142_p10), %s653_s7, 4  ;;  %s577_s8 = int_to_ptr.vmem [resolvable:$false] %s576_s8 }
  0x12   : > { %493 = vmatpush1.bf16.msra.mxu0 (!%p142_p10), %v492_v8  ;;  %510 = vmatpush1.bf16.msra.mxu1 (!%p142_p10), %v492_v8  ;;  %v498_v15 = vpack.c.bf16 (!%p142_p10), %v201_v13, %v199_v12  ;;  %v203_v18 = vld [vmem:[%s871_s1 + $0x68] sm:$0xff] (!%p142_p10)  ;;  %v205_v19 = vld [vmem:[%s871_s1 + $0x78] sm:$0xff] (!%p142_p10)  ;;  %v500_v20 = vpack.c.bf16 (!%p142_p10), %v200_v17, %v198_v16  ;;  %v202_v22 = vld [vmem:[%s871_s1 + $0x60] sm:$0xff] (!%p142_p10)  ;;  %s578_s15 = scalar_lea.vmem (!%p142_p10), %s577_s8, 4096 }
  0x13   : > { %495 = vmatprep.subr.bf16.mxu0 (!%p142_p10), %v494_v9  ;;  %507 = vmatprep.subr.bf16.mxu1 (!%p142_p10), %v494_v9  ;;  %v502_v21 = vpack.c.bf16 (!%p142_p10), %v205_v19, %v203_v18  ;;  %v204_v23 = vld [vmem:[%s871_s1 + $0x70] sm:$0xff] (!%p142_p10) }
  0x14   : > { %v504_v24 = vpack.c.bf16 (!%p142_p10), %v204_v23, %v202_v22 }
  0x16   : > { %s884_s29 = smov (!%p754_p11, %s472_s29), 15  ;;  %497 = vmatpush1.bf16.msra.mxu0 %v496_v14  ;;  %511 = vmatpush1.bf16.msra.mxu1 %v496_v14 }
  0x17   : > { %499 = vmatprep.subr.bf16.mxu0 %v498_v15  ;;  %508 = vmatprep.subr.bf16.mxu1 %v498_v15  ;;  %s473_s20 = sshll.u32 %s884_s29, 3  ;;  %s165_s29 = sand.u32 1, %s634_s10  }
  0x18   : > { %s172_s25 = scalar_lea.vmem %s870_s0, %s473_s20  ;;  %s471_s26 = sshll.u32 %s165_s29, 7 }
  0x19   : > { %v182_v25 = vld [vmem:[%s172_s25] sm:$0xff]  ;;  %v183_v27 = vld [vmem:[%s172_s25 + $0x8] sm:$0xff]  ;;  %v184_v29 = vld [vmem:[%s172_s25 + $0x10] sm:$0xff]  ;;  %s795_s27 = scalar_lea.vmem [#allocation2], %s471_s26  ;;  %s824_s12 = scalar_lea.sflag [#allocation3], %s165_s29 }
  0x1a   : > { %501 = vmatpush1.bf16.msra.mxu0 %v500_v20  ;;  %512 = vmatpush1.bf16.msra.mxu1 %v500_v20  ;;  %v186_v26 = vld [vmem:[%s172_s25 + $0x20] sm:$0xff]  ;;  %v187_v28 = vld [vmem:[%s172_s25 + $0x28] sm:$0xff]  ;;  %v188_v30 = vld [vmem:[%s172_s25 + $0x30] sm:$0xff]  ;;  %s377_s30 = sshll.u32 %s795_s27, 4  ;;  %s816_s30 = int_to_ptr.vmem [resolvable:$true] %s377_s30 }
  0x1b   : > { %503 = vmatprep.subr.bf16.mxu0 %v502_v21  ;;  %509 = vmatprep.subr.bf16.mxu1 %v502_v21  ;;  %v185_v31 = vld [vmem:[%s172_s25 + $0x18] sm:$0xff]  ;;  %s572_s6 = scalar_lea.vmem %s816_s30, 2048  ;;  %p579_p1 = scmp.lt.s32.totalorder %s816_s30, %s577_s8 }
  0x1c   : > { %v189_v32 = vld [vmem:[%s172_s25 + $0x38] sm:$0xff]  ;;  %p573_p12 = scmp.ne.s32.totalorder %s816_s30, %s572_s6  ;;  %p580_p2 = scmp.lt.s32.totalorder %s578_s15, %s572_s6 }
  0x1e   : > { %505 = vmatpush1.bf16.msra.mxu0 %v504_v24  ;;  %513 = vmatpush1.bf16.msra.mxu1 %v504_v24  ;;  %p574_p13 = pnand %p573_p12, %p711_p4  ;;  %p581_p3 = por %p580_p2, %p579_p1 }
  0x20   : > { %p575_p0 = pneg %p574_p13 }
  0x21   : > { %474 = vmatmul.mubr.msk.f32.vlgmr.msra.gmra.mrb[0].mxu0 %vm206_vm0, %v182_v25  ;;  %478 = vmatmul.mubr.msk.f32.vlgmr.msra.gmra.mrb[0].mxu1 %vm206_vm0, %v186_v26 }
  0x22   : > { %301 = vmatprep.mubr.f32.mxu0 %v652_v7  ;;  %325 = vmatprep.mubr.f32.mxu1 %v652_v7  ;;  %p582_p5 = pnand %p581_p3, %p575_p0 }
  0x25   : > { %475 = vmatmul.mubr.msk.f32.gmra.mrb[2].mxu0 %vm206_vm0, %v183_v27  ;;  %479 = vmatmul.mubr.msk.f32.gmra.mrb[2].mxu1 %vm206_vm0, %v187_v28 }
  0x26   : > { %307 = vmatprep.mubr.f32.mxu0 %v652_v7  ;;  %331 = vmatprep.mubr.f32.mxu1 %v652_v7 }
  0x29   : > { %476 = vmatmul.mubr.msk.f32.gmra.mrb[4].mxu0 %vm206_vm0, %v184_v29  ;;  %480 = vmatmul.mubr.msk.f32.gmra.mrb[4].mxu1 %vm206_vm0, %v188_v30 }
  0x2a   : > { %313 = vmatprep.mubr.f32.mxu0 %v652_v7  ;;  %337 = vmatprep.mubr.f32.mxu1 %v652_v7 }
  0x2d   : > { %477 = vmatmul.mubr.msk.f32.gmra.mrb[6].mxu0 %vm206_vm0, %v185_v31  ;;  %481 = vmatmul.mubr.msk.f32.gmra.mrb[6].mxu1 %vm206_vm0, %v189_v32 }
  0xf4   : > { %v297_v33 = vpop.f32.mrb[0].mxu0  ;;  %v321_v34 = vpop.f32.mrb[0].mxu1 }
  0xf5   : > { %344 = vst [vmem:[%s795_s27] sm:$0xff] %v297_v33  ;;  %352 = vst [vmem:[%s795_s27 + $0x40] sm:$0xff] %v321_v34  ;;  %v299_v35 = vpop.f32.mrb[1].mxu0  ;;  %v323_v36 = vpop.f32.mrb[1].mxu1 }
  0xf6   : > { %345 = vst [vmem:[%s795_s27 + $0x8] sm:$0xff] %v299_v35  ;;  %353 = vst [vmem:[%s795_s27 + $0x48] sm:$0xff] %v323_v36 }
  0xf8   : > { %v303_v37 = vpop.f32.mrb[2].mxu0  ;;  %v327_v38 = vpop.f32.mrb[2].mxu1 }
  0xf9   : > { %346 = vst [vmem:[%s795_s27 + $0x10] sm:$0xff] %v303_v37  ;;  %354 = vst [vmem:[%s795_s27 + $0x50] sm:$0xff] %v327_v38  ;;  %v305_v39 = vpop.f32.mrb[3].mxu0  ;;  %v329_v40 = vpop.f32.mrb[3].mxu1 }
  0xfa   : > { %347 = vst [vmem:[%s795_s27 + $0x18] sm:$0xff] %v305_v39  ;;  %355 = vst [vmem:[%s795_s27 + $0x58] sm:$0xff] %v329_v40 }
  0xfc   : > { %v309_v41 = vpop.f32.mrb[4].mxu0  ;;  %v333_v42 = vpop.f32.mrb[4].mxu1 }
  0xfd   : > { %348 = vst [vmem:[%s795_s27 + $0x20] sm:$0xff] %v309_v41  ;;  %356 = vst [vmem:[%s795_s27 + $0x60] sm:$0xff] %v333_v42  ;;  %v311_v43 = vpop.f32.mrb[5].mxu0  ;;  %v335_v44 = vpop.f32.mrb[5].mxu1 }
  0xfe   : > { %349 = vst [vmem:[%s795_s27 + $0x28] sm:$0xff] %v311_v43  ;;  %357 = vst [vmem:[%s795_s27 + $0x68] sm:$0xff] %v335_v44 }
 0x100   : > { %v315_v45 = vpop.f32.mrb[6].mxu0  ;;  %v339_v46 = vpop.f32.mrb[6].mxu1 }
 0x101   : > { %350 = vst [vmem:[%s795_s27 + $0x30] sm:$0xff] %v315_v45  ;;  %358 = vst [vmem:[%s795_s27 + $0x70] sm:$0xff] %v339_v46  ;;  %v317_v47 = vpop.f32.mrb[7].mxu0  ;;  %v341_v48 = vpop.f32.mrb[7].mxu1 }
 0x102   : > { %351 = vst [vmem:[%s795_s27 + $0x38] sm:$0xff] %v317_v47  ;;  %359 = vst [vmem:[%s795_s27 + $0x78] sm:$0xff] %v341_v48 }
 0x103   : > { %585 = shalt.err (!%p582_p5)
}
 0x104   : > { %s586_s16 = scalar_lea.hbm %s814_s5, 2048  ;;  %s590_s23 = scalar_lea.hbm %s872_s2, 4096 }
 0x105   : > { %p587_p6 = scmp.ne.s32.totalorder %s814_s5, %s586_s16  ;;  %p591_p10 = scmp.lt.u32.totalorder %s814_s5, %s872_s2 }
 0x106   : > { %p592_p11 = scmp.lt.u32.totalorder %s590_s23, %s586_s16  ;;  %p594_p13 = scmp.lt.u32.totalorder %s586_s16, %s814_s5 }
 0x107   : > { %p588_p7 = pnand %p587_p6, %p711_p4 }
 0x108   : > { %p593_p12 = por %p592_p11, %p591_p10 }
 0x109   : > { %p589_p9 = pneg %p588_p7 }
 0x10a   : > { %p595_p0 = por %p594_p13, %p593_p12 }
 0x10c   : > { %p596_p1 = pnand %p595_p0, %p589_p9 }
 0x10e   : > { %599 = shalt.err (!%p596_p1)
}
 0x10f   : > { %s654_s29 = smov 256   ;;  %s655_s26 = smov 16  }
 0x110   : > { %514 = dma.vmem_to_hbm [thread:$0]  (%p711_p4), %s816_s30, 2048, %s814_s5, %s824_s12, %s654_s29, %s654_s29, %s655_s26  }
 0x111 PF: > { %p520_p2 = scmp.ge.s32.totalorder %s650_s14, 2  ;;  %s392_s27 = sand.u32 1, %s630_s9  }
 0x112   : > { %s393_s28 = scalar_lea.sflag [#allocation3], %s392_s27 }
 0x113   : > { %p517_p3 = pnand %p520_p2, %p718_p8 }
 0x115   : > { %625 = dma.done.wait (!%p517_p3), %s393_s28, 2048  }
 0x116   : > { %627 = vsyncadd (!%p517_p3), %s393_s28, 4294965248  ;;  %s15_s14 = sadd.s32 1, %s650_s14   ;;  %s876_s9 = smov %s634_s10 }
 0x117   : > { %p12_p5 = scmp.ge.s32.totalorder %s15_s14, 4   ;;  %s877_s10 = smov %s638_s11 }
 0x118   : > { %s878_s11 = smov %s724_s22  ;;  %s879_s12 = smov %s646_s13 }
 0x119   : > { %s880_s13 = smov %s882_s17  ;;  %14 = sbr.rel (!%p12_p5) target bundleno = 4 (0x4), region = 66 }
 0x120   :  { %398 = vsyncpa [#allocation3], 1 }
 0x121   :  { %400 = vsyncpa [#allocation3 + $0x1], 1 }

</bundles_post_ra>
